<compile_context>
chip_gen: v5e
topology: v5e:2x2
jax: 0.10.0
libtpu: 0.0.40
codegen_flags: <defaults>
</compile_context>

<pallas_src>
import functools

import jax
import jax.numpy as jnp
from jax.experimental import pallas as pl
from jax.experimental.pallas import tpu as pltpu


# ----------------------------------------------------------------------------
# Plain-JAX glue: bilinear grid_sample with border padding (align_corners=False)
# TODO(synk): data-dependent gather has no clean Pallas-TPU equivalent; kept in
# JAX.  (Bigger-picture option: precompute corner indices/weights and gather
# inside the kernel to avoid materializing the sampled tensor in HBM.)
# ----------------------------------------------------------------------------
def grid_sample_bilinear_border(img, grid, out_dtype=None):
    """Matches F.grid_sample(img, grid, mode='bilinear', padding_mode='border',
    align_corners=False).  img: [B,C,H,W], grid: [B,Hg,Wg,2] normalized coords."""
    B, C, H, W = img.shape
    gx = grid[..., 0]
    gy = grid[..., 1]
    ix = ((gx + 1.0) * W - 1.0) * 0.5
    iy = ((gy + 1.0) * H - 1.0) * 0.5
    ix = jnp.clip(ix, 0.0, W - 1.0)
    iy = jnp.clip(iy, 0.0, H - 1.0)
    x0 = jnp.floor(ix)
    y0 = jnp.floor(iy)
    wx1 = ix - x0
    wy1 = iy - y0
    wx0 = 1.0 - wx1
    wy0 = 1.0 - wy1
    x0i = x0.astype(jnp.int32)
    y0i = y0.astype(jnp.int32)
    x1i = jnp.minimum(x0i + 1, W - 1)
    y1i = jnp.minimum(y0i + 1, H - 1)

    Hg, Wg = gx.shape[1], gx.shape[2]
    flat = img.reshape(B, C, H * W)

    def gather(yi, xi):
        idx = (yi * W + xi).reshape(B, 1, Hg * Wg)
        idx = jnp.broadcast_to(idx, (B, C, Hg * Wg))
        return jnp.take_along_axis(flat, idx, axis=2).reshape(B, C, Hg, Wg)

    v00 = gather(y0i, x0i)
    v01 = gather(y0i, x1i)
    v10 = gather(y1i, x0i)
    v11 = gather(y1i, x1i)
    out = (v00 * (wy0 * wx0)[:, None] + v01 * (wy0 * wx1)[:, None] +
           v10 * (wy1 * wx0)[:, None] + v11 * (wy1 * wx1)[:, None])
    if out_dtype is not None:
        # cast fuses into the combine -> only one bf16 buffer is written to HBM
        out = out.astype(out_dtype)
    return out


# ----------------------------------------------------------------------------
# Pallas kernel: one (batch, pixel-tile, neighbor) step =
#   correlation (folded group-mean) + 3 pointwise convs + sigmoid.
# ----------------------------------------------------------------------------
def _feature_weight_kernel(x_ref, r_ref, w0_ref, b0_ref, w1_ref, b1_ref,
                           w2_ref, b2_ref, o_ref):
    # x_ref/r_ref: [1, C, TILE] bf16    o_ref: [1, 1, TILE] bf16
    # element-wise correlation against the reference feature (bf16 VPU)
    z = x_ref[0] * r_ref[0]                                        # [C, TILE] bf16

    # conv0 (1x1x1, group-mean + BN folded) + ReLU  -- K = C = 32, bf16 MXU
    t0 = jnp.dot(w0_ref[...], z, preferred_element_type=jnp.float32) + b0_ref[...]
    t0 = jnp.maximum(t0, 0.0).astype(jnp.bfloat16)                 # [16, TILE]

    # conv1 (1x1x1, BN folded) + ReLU
    t1 = jnp.dot(w1_ref[...], t0, preferred_element_type=jnp.float32) + b1_ref[...]
    t1 = jnp.maximum(t1, 0.0).astype(jnp.bfloat16)                 # [8, TILE]

    # similarity conv (1x1x1, bias) + sigmoid
    sim = jnp.dot(w2_ref[...], t1, preferred_element_type=jnp.float32) + b2_ref[...]
    o_ref[0] = jax.nn.sigmoid(sim).astype(o_ref.dtype)             # [1, TILE]


def _choose_tile_p(p_pad, cap):
    """Largest multiple of 128 that divides p_pad and is <= cap."""
    limit = min(cap, p_pad)
    best = 128
    t = 128
    while t <= limit:
        if p_pad % t == 0:
            best = t
        t += 128
    return best


def feature_weight_pallas(x, ref_g, w0, b0, w1, b1, w2, b2, *, tile_p_max=4096):
    """x: [B, C, N, P] bf16   ref_g: [B, C, P] bf16   ->   [B, N, P] f32."""
    B, C, N, P = x.shape

    # Pad the pixel axis to a multiple of 128.
    P_pad = ((P + 127) // 128) * 128
    if P_pad != P:
        x = jnp.pad(x, ((0, 0), (0, 0), (0, 0), (0, P_pad - P)))
        ref_g = jnp.pad(ref_g, ((0, 0), (0, 0), (0, P_pad - P)))

    tile_p = _choose_tile_p(P_pad, tile_p_max)
    num_pt = P_pad // tile_p              # pixel tiles per neighbor

    # Flatten the neighbor axis into the pixel/lane axis (free reshape).
    x_flat = x.reshape(B, C, N * P_pad)

    # Grid: neighbor axis innermost so the ref tile (index_map independent of n)
    # stays resident in VMEM across all N neighbors of a pixel tile.
    grid = (B, num_pt, N)

    out = pl.pallas_call(
        _feature_weight_kernel,
        out_shape=jax.ShapeDtypeStruct((B, 1, N * P_pad), jnp.bfloat16),
        grid_spec=pltpu.PrefetchScalarGridSpec(
            num_scalar_prefetch=0,
            grid=grid,
            in_specs=[
                # sampled features: one neighbor's pixel tile, [1, C, tile_p]
                pl.BlockSpec((1, C, tile_p),
                             lambda b, p, n: (b, 0, n * num_pt + p)),
                # reference feature tile: invariant along n -> fetched once per
                # (b, p) and reused for all neighbors (no re-DMA).
                pl.BlockSpec((1, C, tile_p), lambda b, p, n: (b, 0, p)),
                pl.BlockSpec(w0.shape, lambda b, p, n: (0, 0)),
                pl.BlockSpec(b0.shape, lambda b, p, n: (0, 0)),
                pl.BlockSpec(w1.shape, lambda b, p, n: (0, 0)),
                pl.BlockSpec(b1.shape, lambda b, p, n: (0, 0)),
                pl.BlockSpec(w2.shape, lambda b, p, n: (0, 0)),
                pl.BlockSpec(b2.shape, lambda b, p, n: (0, 0)),
            ],
            out_specs=pl.BlockSpec((1, 1, tile_p),
                                   lambda b, p, n: (b, 0, n * num_pt + p)),
        ),
        # All steps are independent; all-parallel lets megacore (v7x) split the
        # 9-step neighbor axis even when B == 1 and num_pt == 1.  Single-TC
        # parts (v5e/v6e) just run the grid as a loop with max-size tiles.
        compiler_params=pltpu.CompilerParams(
            dimension_semantics=("parallel", "parallel", "parallel")),
    )(x_flat, ref_g, w0, b0, w1, b1, w2, b2)

    out = out.reshape(B, N, P_pad)
    if P_pad != P:
        out = out[:, :, :P]
    return out.astype(jnp.float32)


# ----------------------------------------------------------------------------
# Parameter setup (deterministic, synthetic) — fold BatchNorm (eval mode) into
# the 1x1x1 convs.
# ----------------------------------------------------------------------------
def _fold_bn(w, gamma, beta, mean, var, eps=1e-5):
    scale = gamma / jnp.sqrt(var + eps)
    w_eff = w * scale[:, None]
    b_eff = beta - mean * scale
    return w_eff, b_eff[:, None]


def make_params(num_feature, neighbors=9, G=8, seed=0):
    del num_feature, neighbors
    key = jax.random.PRNGKey(seed)
    ks = jax.random.split(key, 12)
    # conv0: Conv3d(G -> 16, k=1, bias=False); BN(16)
    w0 = jax.random.normal(ks[0], (16, G), jnp.float32) * 0.3
    g0 = 1.0 + 0.1 * jax.random.normal(ks[1], (16,), jnp.float32)
    be0 = 0.1 * jax.random.normal(ks[2], (16,), jnp.float32)
    m0 = 0.1 * jax.random.normal(ks[3], (16,), jnp.float32)
    v0 = 1.0 + 0.2 * jax.random.uniform(ks[4], (16,), jnp.float32)
    # conv1: Conv3d(16 -> 8, k=1, bias=False); BN(8)
    w1 = jax.random.normal(ks[5], (8, 16), jnp.float32) * 0.3
    g1 = 1.0 + 0.1 * jax.random.normal(ks[6], (8,), jnp.float32)
    be1 = 0.1 * jax.random.normal(ks[7], (8,), jnp.float32)
    m1 = 0.1 * jax.random.normal(ks[8], (8,), jnp.float32)
    v1 = 1.0 + 0.2 * jax.random.uniform(ks[9], (8,), jnp.float32)
    # similarity: Conv3d(8 -> 1, k=1, bias=True)
    w2 = jax.random.normal(ks[10], (1, 8), jnp.float32) * 0.3
    b2 = 0.1 * jax.random.normal(ks[11], (1,), jnp.float32)

    # TODO(synk): BatchNorm3d implemented in eval/inference mode (running stats
    # folded into the 1x1x1 conv); train-mode batch statistics not reproduced.
    w0e, b0e = _fold_bn(w0, g0, be0, m0, v0)
    w1e, b1e = _fold_bn(w1, g1, be1, m1, v1)
    return w0e, b0e, w1e, b1e, w2, b2[:, None]


# ----------------------------------------------------------------------------
# Full FeatureWeightNet forward (wrapper around the Pallas kernel)
# ----------------------------------------------------------------------------
@functools.partial(jax.jit, static_argnames=("G", "neighbors"))
def feature_weight_net_forward(ref_feature, grid, params, *, G=8, neighbors=9):
    """ref_feature: [B,C,H,W], grid: [B, neighbors*H, W, 2] -> [B, neighbors, H, W]"""
    w0, b0, w1, b1, w2, b2 = params
    B, C, H, W = ref_feature.shape
    Cg = C // G
    P = H * W

    # Fold the group-wise mean (over Cg sub-channels) into conv0:
    #   W0'[o, c] = w0[o, c // Cg] / Cg      -> [16, C]
    A = jnp.repeat(jnp.eye(G, dtype=w0.dtype), Cg, axis=1) / Cg
    w0c = jnp.dot(w0, A)

    # bf16 is produced directly inside grid_sample (single bf16 HBM buffer).
    x = grid_sample_bilinear_border(ref_feature, grid,
                                    out_dtype=jnp.bfloat16)      # [B, C, N*H, W]
    x = x.reshape(B, C, neighbors, P)                            # free reshape
    ref_g = ref_feature.reshape(B, C, P).astype(jnp.bfloat16)

    # bf16 MXU operands; biases stay f32, accumulation is f32 in-kernel.
    out = feature_weight_pallas(
        x, ref_g,
        w0c.astype(jnp.bfloat16), b0,
        w1.astype(jnp.bfloat16), b1,
        w2.astype(jnp.bfloat16), b2)                             # [B, N, P] f32
    return out.reshape(B, neighbors, H, W)


# ----------------------------------------------------------------------------
# Pure-JAX reference (same semantics, full f32) for verification
# ----------------------------------------------------------------------------
def reference_forward(ref_feature, grid, params, *, G=8, neighbors=9):
    w0, b0, w1, b1, w2, b2 = params
    B, C, H, W = ref_feature.shape
    x = grid_sample_bilinear_border(ref_feature, grid)
    r = ref_feature.reshape(B, G, C // G, H, W)
    x = x.reshape(B, G, C // G, neighbors, H, W)
    s = (x * r[:, :, :, None]).mean(2)                           # [B, G, N, H, W]

    def pw(w, b, t):
        return jnp.einsum('oi,binhw->bonhw', w, t) + b.reshape(1, -1, 1, 1, 1)

    t0 = jax.nn.relu(pw(w0, b0, s))
    t1 = jax.nn.relu(pw(w1, b1, t0))
    sim = pw(w2, b2, t1)[:, 0]                                   # [B, N, H, W]
    return jax.nn.sigmoid(sim)


if __name__ == "__main__":
    B, C, H, W = 2, 32, 16, 16          # num_feature = 32
    G, N = 8, 9

    key = jax.random.PRNGKey(0)
    k_feat, k_grid = jax.random.split(key)
    ref_feature = jax.random.normal(k_feat, (B, C, H, W), jnp.float32)
    # grid of normalized sampling coords in [-1, 1]: [B, neighbors*H, W, 2]
    grid = jax.random.uniform(k_grid, (B, N * H, W, 2), jnp.float32,
                              minval=-1.0, maxval=1.0)

    params = make_params(C, neighbors=N, G=G, seed=0)

    out = feature_weight_net_forward(ref_feature, grid, params, G=G, neighbors=N)
    out = jax.block_until_ready(out)

    ref = reference_forward(ref_feature, grid, params, G=G, neighbors=N)
    assert out.shape == (B, N, H, W), out.shape
    # sampled/reference features, weights and the kernel output are stored in
    # bf16 (bandwidth optimization); all accumulation is f32 and the sigmoid
    # output stays well within 1e-2 of the full-f32 reference.
    assert jnp.allclose(out, ref, rtol=1e-2, atol=1e-2), (
        float(jnp.max(jnp.abs(out - ref))))

    print("KERNEL_OK")
</pallas_src>

<mosaic_0001>
module attributes {stable_mosaic.version = 11 : i64} {
  func.func @_feature_weight_kernel(%arg0: i32, %arg1: i32, %arg2: i32, %arg3: memref<1x32x256xbf16, #tpu.memory_space<vmem>>, %arg4: memref<1x32x256xbf16, #tpu.memory_space<vmem>>, %arg5: memref<16x32xbf16, #tpu.memory_space<vmem>>, %arg6: memref<16x1xf32, #tpu.memory_space<vmem>>, %arg7: memref<8x16xbf16, #tpu.memory_space<vmem>>, %arg8: memref<8x1xf32, #tpu.memory_space<vmem>>, %arg9: memref<1x8xbf16, #tpu.memory_space<vmem>>, %arg10: memref<1x1xf32, #tpu.memory_space<vmem>>, %arg11: memref<1x1x256xbf16, #tpu.memory_space<vmem>>) attributes {dimension_semantics = [#tpu.dimension_semantics<parallel>, #tpu.dimension_semantics<parallel>, #tpu.dimension_semantics<parallel>], iteration_bounds = array<i64: 2, 1, 9>, scalar_prefetch = 0 : i64, scratch_operands = 0 : i64, tpu.core_type = #tpu.core_type<tc>, window_params = [{transform_indices = @transform_0, window_bounds = array<i64: 1, 32, 256>}, {transform_indices = @transform_1, window_bounds = array<i64: 1, 32, 256>}, {pipeline_mode = #tpu.pipeline_mode<synchronous>, transform_indices = @transform_2, window_bounds = array<i64: 16, 32>}, {pipeline_mode = #tpu.pipeline_mode<synchronous>, transform_indices = @transform_3, window_bounds = array<i64: 16, 1>}, {pipeline_mode = #tpu.pipeline_mode<synchronous>, transform_indices = @transform_4, window_bounds = array<i64: 8, 16>}, {pipeline_mode = #tpu.pipeline_mode<synchronous>, transform_indices = @transform_5, window_bounds = array<i64: 8, 1>}, {pipeline_mode = #tpu.pipeline_mode<synchronous>, transform_indices = @transform_6, window_bounds = array<i64: 1, 8>}, {pipeline_mode = #tpu.pipeline_mode<synchronous>, transform_indices = @transform_7, window_bounds = array<i64: 1, 1>}, {transform_indices = @transform_8, window_bounds = array<i64: 1, 1, 256>}]} {
    %c0 = arith.constant 0 : index
    %c0_0 = arith.constant 0 : index
    %c0_1 = arith.constant 0 : index
    %0 = vector.load %arg3[%c0, %c0_0, %c0_1] : memref<1x32x256xbf16, #tpu.memory_space<vmem>>, vector<1x32x256xbf16>
    %1 = vector.shape_cast %0 : vector<1x32x256xbf16> to vector<32x256xbf16>
    %c0_2 = arith.constant 0 : index
    %c0_3 = arith.constant 0 : index
    %c0_4 = arith.constant 0 : index
    %2 = vector.load %arg4[%c0_2, %c0_3, %c0_4] : memref<1x32x256xbf16, #tpu.memory_space<vmem>>, vector<1x32x256xbf16>
    %3 = vector.shape_cast %2 : vector<1x32x256xbf16> to vector<32x256xbf16>
    %4 = arith.mulf %1, %3 : vector<32x256xbf16>
    %c0_5 = arith.constant 0 : index
    %c0_6 = arith.constant 0 : index
    %5 = vector.load %arg5[%c0_5, %c0_6] : memref<16x32xbf16, #tpu.memory_space<vmem>>, vector<16x32xbf16>
    %cst = arith.constant dense<0.000000e+00> : vector<16x256xf32>
    %6 = tpu.matmul %5, %4, %cst {dimension_numbers = #tpu.dot_dimension_numbers<[1], [0], [0], [1], [0, 0, 1, 1], [], []>} : vector<16x32xbf16>, vector<32x256xbf16>, vector<16x256xf32> -> vector<16x256xf32>
    %c0_7 = arith.constant 0 : index
    %c0_8 = arith.constant 0 : index
    %7 = vector.load %arg6[%c0_7, %c0_8] : memref<16x1xf32, #tpu.memory_space<vmem>>, vector<16x1xf32>
    %8 = vector.broadcast %7 : vector<16x1xf32> to vector<16x256xf32>
    %9 = arith.addf %6, %8 : vector<16x256xf32>
    %cst_9 = arith.constant 0.000000e+00 : f32
    %10 = vector.broadcast %cst_9 : f32 to vector<16x256xf32>
    %11 = arith.maximumf %9, %10 : vector<16x256xf32>
    %12 = arith.truncf %11 : vector<16x256xf32> to vector<16x256xbf16>
    %c0_10 = arith.constant 0 : index
    %c0_11 = arith.constant 0 : index
    %13 = vector.load %arg7[%c0_10, %c0_11] : memref<8x16xbf16, #tpu.memory_space<vmem>>, vector<8x16xbf16>
    %cst_12 = arith.constant dense<0.000000e+00> : vector<8x256xf32>
    %14 = tpu.matmul %13, %12, %cst_12 {dimension_numbers = #tpu.dot_dimension_numbers<[1], [0], [0], [1], [0, 0, 1, 1], [], []>} : vector<8x16xbf16>, vector<16x256xbf16>, vector<8x256xf32> -> vector<8x256xf32>
    %c0_13 = arith.constant 0 : index
    %c0_14 = arith.constant 0 : index
    %15 = vector.load %arg8[%c0_13, %c0_14] : memref<8x1xf32, #tpu.memory_space<vmem>>, vector<8x1xf32>
    %16 = vector.broadcast %15 : vector<8x1xf32> to vector<8x256xf32>
    %17 = arith.addf %14, %16 : vector<8x256xf32>
    %cst_15 = arith.constant 0.000000e+00 : f32
    %18 = vector.broadcast %cst_15 : f32 to vector<8x256xf32>
    %19 = arith.maximumf %17, %18 : vector<8x256xf32>
    %20 = arith.truncf %19 : vector<8x256xf32> to vector<8x256xbf16>
    %c0_16 = arith.constant 0 : index
    %c0_17 = arith.constant 0 : index
    %21 = vector.load %arg9[%c0_16, %c0_17] : memref<1x8xbf16, #tpu.memory_space<vmem>>, vector<1x8xbf16>
    %cst_18 = arith.constant dense<0.000000e+00> : vector<1x256xf32>
    %22 = tpu.matmul %21, %20, %cst_18 {dimension_numbers = #tpu.dot_dimension_numbers<[1], [0], [0], [1], [0, 0, 1, 1], [], []>} : vector<1x8xbf16>, vector<8x256xbf16>, vector<1x256xf32> -> vector<1x256xf32>
    %c0_19 = arith.constant 0 : index
    %c0_20 = arith.constant 0 : index
    %23 = vector.load %arg10[%c0_19, %c0_20] : memref<1x1xf32, #tpu.memory_space<vmem>>, vector<1x1xf32>
    %24 = vector.broadcast %23 : vector<1x1xf32> to vector<1x256xf32>
    %25 = arith.addf %22, %24 : vector<1x256xf32>
    %26 = arith.negf %25 : vector<1x256xf32>
    %27 = math.exp %26 : vector<1x256xf32>
    %cst_21 = arith.constant 1.000000e+00 : f32
    %28 = vector.broadcast %cst_21 : f32 to vector<1x256xf32>
    %29 = arith.addf %28, %27 : vector<1x256xf32>
    %30 = arith.divf %28, %29 : vector<1x256xf32>
    %31 = arith.truncf %30 : vector<1x256xf32> to vector<1x256xbf16>
    %c0_22 = arith.constant 0 : index
    %c0_23 = arith.constant 0 : index
    %c0_24 = arith.constant 0 : index
    %32 = vector.load %arg11[%c0_22, %c0_23, %c0_24] : memref<1x1x256xbf16, #tpu.memory_space<vmem>>, vector<1x1x256xbf16>
    %33 = vector.shape_cast %32 : vector<1x1x256xbf16> to vector<1x256xbf16>
    %34 = vector.shape_cast %31 : vector<1x256xbf16> to vector<1x1x256xbf16>
    tpu.vector_store %arg11[%c0_22, %c0_23, %c0_24], %34 {strides = array<i32>} : memref<1x1x256xbf16, #tpu.memory_space<vmem>>, vector<1x1x256xbf16>,
    return
  }
  func.func @transform_0(%arg0: i32, %arg1: i32, %arg2: i32) -> (i32, i32, i32) {
    %c1_i32 = arith.constant 1 : i32
    %0 = arith.muli %arg2, %c1_i32 : i32
    %1 = arith.addi %0, %arg1 : i32
    %c0_i32 = arith.constant 0 : i32
    %c0_i32_0 = arith.constant 0 : i32
    return %arg0, %c0_i32, %1 : i32, i32, i32
  }
  func.func @transform_1(%arg0: i32, %arg1: i32, %arg2: i32) -> (i32, i32, i32) {
    %c0_i32 = arith.constant 0 : i32
    %c0_i32_0 = arith.constant 0 : i32
    return %arg0, %c0_i32, %arg1 : i32, i32, i32
  }
  func.func @transform_2(%arg0: i32, %arg1: i32, %arg2: i32) -> (i32, i32) {
    %c0_i32 = arith.constant 0 : i32
    %c0_i32_0 = arith.constant 0 : i32
    %c0_i32_1 = arith.constant 0 : i32
    return %c0_i32, %c0_i32_0 : i32, i32
  }
  func.func @transform_3(%arg0: i32, %arg1: i32, %arg2: i32) -> (i32, i32) {
    %c0_i32 = arith.constant 0 : i32
    %c0_i32_0 = arith.constant 0 : i32
    %c0_i32_1 = arith.constant 0 : i32
    return %c0_i32, %c0_i32_0 : i32, i32
  }
  func.func @transform_4(%arg0: i32, %arg1: i32, %arg2: i32) -> (i32, i32) {
    %c0_i32 = arith.constant 0 : i32
    %c0_i32_0 = arith.constant 0 : i32
    %c0_i32_1 = arith.constant 0 : i32
    return %c0_i32, %c0_i32_0 : i32, i32
  }
  func.func @transform_5(%arg0: i32, %arg1: i32, %arg2: i32) -> (i32, i32) {
    %c0_i32 = arith.constant 0 : i32
    %c0_i32_0 = arith.constant 0 : i32
    %c0_i32_1 = arith.constant 0 : i32
    return %c0_i32, %c0_i32_0 : i32, i32
  }
  func.func @transform_6(%arg0: i32, %arg1: i32, %arg2: i32) -> (i32, i32) {
    %c0_i32 = arith.constant 0 : i32
    %c0_i32_0 = arith.constant 0 : i32
    %c0_i32_1 = arith.constant 0 : i32
    return %c0_i32, %c0_i32_0 : i32, i32
  }
  func.func @transform_7(%arg0: i32, %arg1: i32, %arg2: i32) -> (i32, i32) {
    %c0_i32 = arith.constant 0 : i32
    %c0_i32_0 = arith.constant 0 : i32
    %c0_i32_1 = arith.constant 0 : i32
    return %c0_i32, %c0_i32_0 : i32, i32
  }
  func.func @transform_8(%arg0: i32, %arg1: i32, %arg2: i32) -> (i32, i32, i32) {
    %c1_i32 = arith.constant 1 : i32
    %0 = arith.muli %arg2, %c1_i32 : i32
    %1 = arith.addi %0, %arg1 : i32
    %c0_i32 = arith.constant 0 : i32
    %c0_i32_0 = arith.constant 0 : i32
    return %arg0, %c0_i32, %1 : i32, i32, i32
  }
}

</mosaic_0001>

<bundles_post_ra>
// kernel: feature_weight_net_forward.1
= control target key start
LH: loop header
LB: loop body
LE: loop exit
PB: predicated region body
PF: predicated region fallthrough
CT: control target
= control target key end

     0   :  { %s1104_s0 = inlined_call_operand.vmem [shape: bf16[2,32,2304], index: 0, kind: input, shape index: {}]   ;;  %s1105_s1 = inlined_call_operand.vmem [shape: bf16[2,32,256], index: 1, kind: input, shape index: {}]   ;;  %s1106_s2 = inlined_call_operand.vmem [shape: bf16[16,32], index: 2, kind: input, shape index: {}]   ;;  %s1107_s3 = inlined_call_operand.vmem [shape: f32[16,1], index: 3, kind: input, shape index: {}]   ;;  %s1108_s4 = inlined_call_operand.vmem [shape: bf16[8,16], index: 4, kind: input, shape index: {}]   ;;  %s1109_s5 = inlined_call_operand.vmem [shape: f32[8,1], index: 5, kind: input, shape index: {}]   ;;  %s1110_s6 = inlined_call_operand.vmem [shape: bf16[1,8], index: 6, kind: input, shape index: {}]   ;;  %s1111_s7 = inlined_call_operand.<no memory space> [shape: f32[1,1], index: 7, kind: input, shape index: {}]   ;;  %s1112_s8 = inlined_call_operand.vmem [shape: bf16[2,1,2304], index: 8, kind: output, shape index: {}]  }
   0x1   :  { %v13_v0 = vstv %s1111_s7 }
   0x2   :  { %14 = vst [vmem:[#allocation2] sm:$0x1] %v13_v0 }
   0x3   :  { %s984_s29 = smov 0   ;;  %s986_s30 = smov 0  }
   0x4   :  { %s988_s9 = smov 0   ;;  %s990_s10 = smov 0  }
   0x5   :  { %s992_s11 = smov 0   ;;  %s994_s12 = smov 0  }
   0x6   :  { %s996_s13 = smov 0  }
   0x7 LB: > { %s32_s7 = sadd.s32 1, %s925_s11  ;;  %s39_s14 = sadd.s32 1, %s929_s12  ;;  %s933_s13 = sphi %s996_s13, %s20_s13   ;;  %s929_s12 = sphi %s994_s12, %s1118_s12   ;;  %s925_s11 = sphi %s992_s11, %s1117_s11   ;;  %s921_s10 = sphi %s990_s10, %s1116_s10   ;;  %s917_s9 = sphi %s988_s9, %s1115_s9   ;;  %s913_s30 = sphi %s986_s30, %s1114_s30   ;;  %s909_s29 = sphi %s984_s29, %s1113_s29  }
   0x8   : > { %p33_p0 = scmp.ge.s32.totalorder %s32_s7, 9  ;;  %p57_p1 = scmp.ne.s32.totalorder %s913_s30, %s909_s29 }
   0x9   : > { %p58_p2 = scmp.eq.s32.totalorder %s933_s13, 0  ;;  %s50_s18 = sadd.s32 1, %s913_s30 }
   0xa   : > { %s1120_s7 = smov (%p33_p0, %s32_s7), 0  ;;  %s1122_s14 = smov (!%p33_p0, %s39_s14), %s929_s12 }
   0xb   : > { %p59_p3 = por %p58_p2, %p57_p1  ;;  %p41_p4 = scmp.ge.s32.totalorder %s1122_s14, 2 }
   0xc   : > { %s46_s15 = ssub.s32 %s925_s11, %s1120_s7  ;;  %p785_p6 = scmp.ge.s32.totalorder %s933_s13, 18 }
   0xd   : > { %s1124_s14 = smov (%p41_p4, %s1122_s14), 0 }
   0xe   : > { %s45_s16 = ssub.s32 %s929_s12, %s1124_s14  ;;  %285 = sbr.rel (%p785_p6) target bundleno = 31 (0x1f), region = 40 }
   0xf   : > { %s47_s17 = sor.u32 %s46_s15, %s45_s16 }
  0x10   : > { %p48_p5 = scmp.eq.s32.totalorder %s47_s17, 0 }
  0x12   : > { %s1035_s19 = scalar_select %p48_p5, %s913_s30, %s50_s18  }
  0x13   : > { %288 = sbr.rel (!%p59_p3) target bundleno = 31 (0x1f), region = 44  ;;  %s290_s20 = sand.u32 (%p59_p3), 1, %s913_s30  }
  0x14   : > { %s787_s21 = sshll.u32 (%p59_p3), %s925_s11, 1  ;;  %s786_s22 = sshll.u32 (%p59_p3), %s290_s20, 5 }
  0x15   : > { %s810_s23 = smul.u32 (%p59_p3), 72, %s929_s12  ;;  %s292_s15 = scalar_lea.vmem (%p59_p3), [#allocation3], %s786_s22 }
  0x17   : > { %s296_s24 = sadd.s32 (%p59_p3), %s810_s23, %s787_s21 }
  0x18   : > { %s788_s25 = sshll.u32 %s296_s24, 2 }
  0x19   : > { %s298_s28 = scalar_lea.vmem %s1104_s0, %s788_s25 }
  0x1a   : > { %v333_v1 = vld [vmem:[%s298_s28] sm:$0xff]  ;;  %v335_v2 = vld [vmem:[%s298_s28 + $0x48] sm:$0xff]  ;;  %v337_v3 = vld [vmem:[%s298_s28 + $0x90] sm:$0xff] }
  0x1b   : > { %334 = vst [vmem:[%s292_s15] sm:$0xff] %v333_v1  ;;  %v339_v4 = vld [vmem:[%s298_s28 + $0xd8] sm:$0xff] }
  0x1c   : > { %336 = vst [vmem:[%s292_s15 + $0x8] sm:$0xff] %v335_v2 }
  0x1d   : > { %338 = vst [vmem:[%s292_s15 + $0x10] sm:$0xff] %v337_v3 }
  0x1e   : > { %340 = vst [vmem:[%s292_s15 + $0x18] sm:$0xff] %v339_v4 }
  0x1f PF: > { %p789_p7 = scmp.ge.s32.totalorder %s933_s13, 1  ;;  %p358_p8 = scmp.lt.s32.totalorder %s933_s13, 19 }
  0x21   : > { %p359_p9 = pnand %p789_p7, %p358_p8 }
  0x22   : > { %s365_s16 = sand.u32 (!%p359_p9), 1, %s909_s29   ;;  %p414_p10 = scmp.lt.s32.totalorder (!%p359_p9), %s921_s10, 1 }
  0x23   : > { %362 = sbr.rel (%p359_p9) target bundleno = 512 (0x200), region = 86  ;;  %s790_s20 = sshll.u32 (!%p359_p9), %s365_s16, 5 }
  0x24   : > { %s367_s21 = scalar_lea.vmem (!%p359_p9), [#allocation3], %s790_s20 }
  0x28   : > { %v473_v5 = vld [vmem:[%s1107_s3] sm:$0xff]  ;;  %v935_v6 = vmov 0   ;;  %s1126_s10 = smov (!%p414_p10, %s921_s10), 1  ;;  %v437_v7 = vld [vmem:[%s367_s21 + $0x10] sm:$0xff]  ;;  %v436_v10 = vld [vmem:[%s367_s21 + $0x8] sm:$0xff]  ;;  %vm490_vm0 = vcmask 261120  }
  0x29   : > { %869 = vset.pattern.permute.xlu0 %v935_v6  ;;  %870 = vset.pattern.permute.xlu1 %v935_v6  ;;  %v438_v8 = vld [vmem:[%s367_s21 + $0x18] sm:$0xff]  ;;  %v435_v9 = vld [vmem:[%s367_s21] sm:$0xff]  ;;  %s808_s22 = sshll.u32 %s1126_s10, 5  ;;  %v447_v11 = vunpack.c.l.bf16 %v437_v7  ;;  %v448_v13 = vunpack.c.h.bf16 %v437_v7  ;;  %v445_v20 = vunpack.c.l.bf16 %v436_v10  ;;  %v446_v22 = vunpack.c.h.bf16 %v436_v10  ;;  %s811_s29 = smul.u32 18, %s1126_s10 }
  0x2a   : > { %477 = vperm.xlu0 %869, %v473_v5   ;;  %s421_s24 = scalar_lea.vmem %s1105_s1, %s808_s22  ;;  %v449_v12 = vunpack.c.l.bf16 %v438_v8  ;;  %v450_v14 = vunpack.c.h.bf16 %v438_v8  ;;  %v474_v15 = vld [vmem:[%s1107_s3 + $0x8] sm:$0xff]  ;;  %v443_v19 = vunpack.c.l.bf16 %v435_v9  ;;  %v444_v21 = vunpack.c.h.bf16 %v435_v9  ;;  %v809_v44 = vld [vmem:[%s1106_s2] sm:$0xff]  ;;  %s793_s22 = sshll.u32 %s917_s9, 1 }
  0x2b   : > { %v441_v16 = vld [vmem:[%s421_s24 + $0x10] sm:$0xff]  ;;  %v442_v17 = vld [vmem:[%s421_s24 + $0x18] sm:$0xff]  ;;  %v439_v18 = vld [vmem:[%s421_s24] sm:$0xff]  ;;  %vm535_vm1 = vcmask 130048   ;;  %vm581_vm2 = vcmask 1043456   ;;  %vm577_vm3 = vcmask 64512  }
  0x2c   : > { %v455_v23 = vunpack.c.l.bf16 %v441_v16  ;;  %v457_v24 = vunpack.c.l.bf16 %v442_v17  ;;  %v456_v25 = vunpack.c.h.bf16 %v441_v16  ;;  %v458_v26 = vunpack.c.h.bf16 %v442_v17  ;;  %v440_v27 = vld [vmem:[%s421_s24 + $0x8] sm:$0xff]  ;;  %v529_v45 = vld [vmem:[%s1109_s5] sm:$0xff]  ;;  %p427_p11 = scmp.lt.s32.totalorder %s793_s22, 17 }
  0x2d   : > { %v451_v28 = vunpack.c.l.bf16 %v439_v18  ;;  %v453_v29 = vunpack.c.l.bf16 %v440_v27  ;;  %v452_v30 = vunpack.c.h.bf16 %v439_v18  ;;  %v454_v31 = vunpack.c.h.bf16 %v440_v27  ;;  %532 = vperm.xlu1 %870, %v529_v45   ;;  %v570_v46 = vld [vmem:[#allocation2] sm:$0x1] }
  0x2e   : > { %v463_v32 = vmul.f32 %v455_v23, %v447_v11  ;;  %v465_v33 = vmul.f32 %v457_v24, %v449_v12  ;;  %v464_v34 = vmul.f32 %v456_v25, %v448_v13  ;;  %v466_v35 = vmul.f32 %v458_v26, %v450_v14  ;;  %v528_v63 = vld [vmem:[%s1108_s4] sm:$0xf]  ;;  %s1128_s22 = smov (!%p427_p11, %s793_s22), 17 }
  0x2f   : > { %v459_v36 = vmul.f32 %v451_v28, %v443_v19  ;;  %v461_v37 = vmul.f32 %v453_v29, %v445_v20  ;;  %v460_v38 = vmul.f32 %v452_v30, %v444_v21  ;;  %v462_v39 = vmul.f32 %v454_v31, %v446_v22  ;;  %v569_v13 = vld [vmem:[%s1110_s6] sm:$0x1]  ;;  %s430_s9 = sadd.s32 %s811_s29, %s1128_s22 }
  0x30   : > { %v469_v40 = vpack.c.bf16 %v465_v33, %v463_v32  ;;  %v470_v41 = vpack.c.bf16 %v466_v35, %v464_v34  ;;  %vm655_vm6 = vcmask 1040384   ;;  %vm661_vm8 = vsmask.f32 256  ;;  %s431_s24 = scalar_lea.vmem %s1112_s8, %s430_s9 }
  0x31   : > { %v467_v42 = vpack.c.bf16 %v461_v37, %v459_v36  ;;  %v468_v43 = vpack.c.bf16 %v462_v39, %v460_v38  ;;  %vm663_vm9 = vcmask 1041409   ;;  %vm664_vm12 = vsmask.f32 1280 }
  0x32   : > { %482 = vperm.xlu0 %869, %v474_v15   ;;  %500 = vmatpush.bf16.msra.mxu0 %v469_v40 }
  0x33   : > { %514 = vmatpush.bf16.msra.mxu1 %v470_v41 }
  0x35   : > { %573 = vperm.xlu1 %870, %v570_v46  }
  0x36   : > { %501 = vmatpush.bf16.msra.mxu0 %v467_v42 }
  0x37   : > { %515 = vmatpush.bf16.msra.mxu1 %v468_v43 }
  0x39   : > { %798 = vmatmul.msk.bf16.vlgmr.msra.gmra.mxu0 %vm490_vm0, %v809_v44 }
  0x3a   : > { %799 = vmatmul.msk.bf16.vlgmr.msra.gmra.mxu1 %vm490_vm0, %v809_v44  ;;  %vm662_vm0 = vmand %vm655_vm6, %vm661_vm8 }
  0x9c   : > { %v478_v47 = vpop.permute.xlu0 %477 }
  0x9f   : > { %v533_v0 = vpop.permute.xlu1 %532 }
  0xa4   : > { %v483_v50 = vpop.permute.xlu0 %482 }
  0xa7   : > { %v574_v14 = vpop.permute.xlu1 %573 }
  0xa8   : > { %v576_v15 = vperm.slane %v574_v14, 0 }
  0xb6   : > { %v503_v48 = vpop.f32.mrf.mxu0 }
  0xb7   : > { %v517_v49 = vpop.f32.mrf.mxu1  ;;  %v504_v51 = vadd.f32 %v503_v48, %v478_v47 }
  0xb8   : > { %v518_v52 = vadd.f32 %v517_v49, %v478_v47  ;;  %v667_v49 = vld [vmem:[%s431_s24] sm:$0x3] }
  0xb9   : > { %v522_v57 = vmax.f32 %v504_v51, 0.0 }
  0xba   : > { %v523_v58 = vmax.f32 %v518_v52, 0.0 }
  0xbe   : > { %v505_v53 = vpop.f32.mrf.mxu0 }
  0xbf   : > { %v519_v54 = vpop.f32.mrf.mxu1  ;;  %v506_v55 = vadd.f32 %v505_v53, %v483_v50 }
  0xc0   : > { %v520_v56 = vadd.f32 %v519_v54, %v483_v50 }
  0xc1   : > { %v524_v59 = vmax.f32 %v506_v55, 0.0 }
  0xc2   : > { %v525_v60 = vmax.f32 %v520_v56, 0.0 }
  0xc3   : > { %v526_v61 = vpack.c.bf16 %v524_v59, %v522_v57 }
  0xc4   : > { %v527_v62 = vpack.c.bf16 %v525_v60, %v523_v58 }
  0xc5   : > { %546 = vmatpush.bf16.msra.mxu2 %v526_v61 }
  0xc6   : > { %559 = vmatpush.bf16.msra.mxu3 %v527_v62 }
  0xc8   : > { %800 = vmatmul.msk.bf16.vlgmr.msra.gmra.mxu2 %vm535_vm1, %v528_v63 }
  0xc9   : > { %801 = vmatmul.msk.bf16.vlgmr.msra.gmra.mxu3 %vm535_vm1, %v528_v63  ;;  %vm665_vm1 = vmand %vm663_vm9, %vm664_vm12 }
 0x14b   : > { %v548_v1 = vpop.f32.mrf.mxu2 }
 0x14c   : > { %v561_v2 = vpop.f32.mrf.mxu3  ;;  %v549_v3 = vadd.f32 %v548_v1, %v533_v0 }
 0x14d   : > { %v562_v4 = vadd.f32 %v561_v2, %v533_v0 }
 0x14e   : > { %v565_v5 = vmax.f32 %v549_v3, 0.0 }
 0x14f   : > { %v566_v6 = vmax.f32 %v562_v4, 0.0 }
 0x150   : > { %v567_v7 = vpack.c.bf16 %v565_v5, %v565_v5 }
 0x151   : > { %v568_v8 = vpack.c.bf16 %v566_v6, %v566_v6 }
 0x152   : > { %v583_v9 = vsel %vm581_vm2, %v567_v7, 0 }
 0x153   : > { %v586_v10 = vsel %vm581_vm2, %v568_v8, 0  ;;  %v550_v11 = vpop.f32.mrf.mxu2  ;;  %595 = vmatpush.bf16.msrb.mxu2 %v583_v9  ;;  %vm666_vm2 = vmor %vm665_vm1, %vm662_vm0 }
 0x154   : > { %v563_v12 = vpop.f32.mrf.mxu3  ;;  %608 = vmatpush.bf16.msrb.mxu3 %v586_v10 }
 0x156   : > { %802 = vmatmul.msk.bf16.vlgmr.msrb.gmra.mxu2 %vm577_vm3, %v569_v13 }
 0x157   : > { %803 = vmatmul.msk.bf16.vlgmr.msrb.gmra.mxu3 %vm577_vm3, %v569_v13 }
 0x1d9   : > { %v597_v16 = vpop.f32.mrf.mxu2 }
 0x1da   : > { %v610_v17 = vpop.f32.mrf.mxu3  ;;  %v598_v18 = vadd.f32 %v597_v16, %v576_v15 }
 0x1db   : > { %v611_v19 = vadd.f32 %v610_v17, %v576_v15 }
 0x1dc   : > { %v804_v20 = vmul.f32 -1.442695, %v598_v18 }
 0x1dd   : > { %v805_v21 = vmul.f32 -1.442695, %v611_v19 }
 0x1de   : > { %871 = vpow2.f32 %v804_v20 }
 0x1df   : > { %873 = vpow2.f32 %v805_v21 }
 0x1e1   : > { %v599_v22 = vpop.f32.mrf.mxu2 }
 0x1e2   : > { %v612_v23 = vpop.f32.mrf.mxu3 }
 0x1e4   : > { %v872_v24 = vpop.eup %871 }
 0x1e5   : > { %v874_v25 = vpop.eup %873  ;;  %v620_v26 = vadd.f32 1.0, %v872_v24 }
 0x1e6   : > { %v621_v27 = vadd.f32 1.0, %v874_v25 }
 0x1e7   : > { %875 = vrcp.f32 %v620_v26  ;;  %v633_v33 = vand.u32 2147483648, %v620_v26  ;;  %v631_v36 = vand.u32 2147483647, %v620_v26  ;;  %vm627_vm7 = vweird.f32 %v620_v26 }
 0x1e8   : > { %877 = vrcp.f32 %v621_v27  ;;  %v648_v37 = vand.u32 2147483648, %v621_v27  ;;  %v646_v39 = vand.u32 2147483647, %v621_v27  ;;  %vm642_vm11 = vweird.f32 %v621_v27 }
 0x1e9   : > { %v634_v41 = vor.u32 1.1754944e-38, %v633_v33  ;;  %vm632_vm13 = vcmp.eq.f32.partialorder %v631_v36, 8.507059e+37 }
 0x1ea   : > { %v649_v44 = vor.u32 1.1754944e-38, %v648_v37  ;;  %vm647_vm15 = vcmp.eq.f32.partialorder %v646_v39, 8.507059e+37 }
 0x1ed   : > { %v876_v28 = vpop.eup %875 }
 0x1ee   : > { %v878_v29 = vpop.eup %877  ;;  %v623_v30 = vmul.f32 %v876_v28, %v620_v26  ;;  %vm628_vm4 = vweird.f32 %v876_v28 }
 0x1ef   : > { %v638_v31 = vmul.f32 %v878_v29, %v621_v27  ;;  %vm643_vm5 = vweird.f32 %v878_v29  ;;  %vm629_vm10 = vmor %vm627_vm7, %vm628_vm4 }
 0x1f0   : > { %v624_v32 = vsub.f32 1.0, %v623_v30  ;;  %vm644_vm14 = vmor %vm642_vm11, %vm643_vm5 }
 0x1f1   : > { %v639_v34 = vsub.f32 1.0, %v638_v31 }
 0x1f2   : > { %v625_v35 = vmul.f32 %v876_v28, %v624_v32 }
 0x1f3   : > { %v640_v38 = vmul.f32 %v878_v29, %v639_v34 }
 0x1f4   : > { %v626_v40 = vadd.f32 %v876_v28, %v625_v35 }
 0x1f5   : > { %v641_v42 = vadd.f32 %v878_v29, %v640_v38 }
 0x1f6   : > { %v630_v43 = vsel %vm629_vm10, %v876_v28, %v626_v40 }
 0x1f7   : > { %v635_v45 = vsel %vm632_vm13, %v634_v41, %v630_v43  ;;  %v645_v46 = vsel %vm644_vm14, %v878_v29, %v641_v42 }
 0x1f8   : > { %v650_v47 = vsel %vm647_vm15, %v649_v44, %v645_v46 }
 0x1f9   : > { %v652_v48 = vpack.c.bf16 %v650_v47, %v635_v45 }
 0x1fb   : > { %v654_v50 = vrot.slane %v652_v48, 3 }
 0x1fd   : > { %v658_v51 = vsel %vm655_vm6, %v652_v48, %v654_v50 }
 0x1fe   : > { %v668_v52 = vsel %vm666_vm2, %v658_v51, %v667_v49 }
 0x1ff   : > { %669 = vst [vmem:[%s431_s24] sm:$0x3] %v668_v52 }
 0x200 PF: > { %s20_s13 = sadd.s32 1, %s933_s13   ;;  %s1113_s29 = smov %s913_s30 }
 0x201   : > { %p17_p12 = scmp.ge.s32.totalorder %s20_s13, 20   ;;  %s1114_s30 = smov %s1035_s19 }
 0x202   : > { %s1115_s9 = smov %s925_s11  ;;  %s1116_s10 = smov %s929_s12 }
 0x203   : > { %s1117_s11 = smov %s1120_s7  ;;  %s1118_s12 = smov %s1124_s14 }
 0x204   :  { %19 = sbr.rel (!%p17_p12) target bundleno = 7 (0x7), region = 128 }

</bundles_post_ra>
